<compile_context>
chip_gen: v7x
topology: tpu7x:2x2x1
jax: 0.10.0
libtpu: 0.0.40
codegen_flags: <defaults>
</compile_context>

<pallas_src>
import functools

import jax
import jax.numpy as jnp
from jax import lax
from jax.experimental import pallas as pl
from jax.experimental.pallas import tpu as pltpu

LANE = 128
# Rows per grid step: large enough to amortize the ~0.35 us per-step cost and
# fill the 256-row MXU on v6e/v7x, small enough that the f32 intermediates
# (tile_b x H_pad x 4 B each) fit v5e's 16 MiB default scoped VMEM.
MAX_TILE_B = 1024


def _round_up(x, m):
    return (x + m - 1) // m * m


def _batch_tiling(batch, max_tile=MAX_TILE_B):
    """Pick (tile_b, num_tiles) for the batch grid."""
    if batch <= max_tile:
        # Clean large-ish batch: two tiles so the ("parallel",) axis can be
        # sharded across v7x's two TensorCores.
        if batch >= 512 and batch % 256 == 0:
            return batch // 2, 2
        # Small batch: one grid step; block == full array dims, no padding.
        return batch, 1
    return max_tile, pl.cdiv(batch, max_tile)


def qnet_kernel(x_ref, w1_ref, b1_ref, w2_ref, b2_ref, w3_ref, b3_ref,
                act_ref, *, action_dim):
    # x: [tile_b, S] f32 -> bf16 in-kernel; weights bf16; biases f32.
    x = x_ref[...].astype(jnp.bfloat16)

    h1 = jnp.dot(x, w1_ref[...], preferred_element_type=jnp.float32)
    h1 = jnp.maximum(h1 + b1_ref[...], 0.0)                        # f32 [tile_b, H_pad]

    h2 = jnp.dot(h1.astype(jnp.bfloat16), w2_ref[...],
                 preferred_element_type=jnp.float32)
    h2 = jnp.maximum(h2 + b2_ref[...], 0.0)                        # f32 [tile_b, H_pad]

    q = jnp.dot(h2.astype(jnp.bfloat16), w3_ref[...],
                preferred_element_type=jnp.float32) + b3_ref[...]  # f32 [tile_b, A_pad]

    # argmax over the real action columns only (padded lanes masked to -inf);
    # first occurrence on ties, matching torch/jnp.argmax.
    a_pad = q.shape[1]
    col = lax.broadcasted_iota(jnp.int32, q.shape, 1)               # [tile_b, A_pad]
    q = jnp.where(col < action_dim, q, -jnp.inf)
    max_q = jnp.max(q, axis=1, keepdims=True)                       # [tile_b, 1]
    idx = jnp.min(jnp.where(q == max_q, col, jnp.int32(a_pad)), axis=1)

    # Lane-dense store: batch runs along the 128-lane axis of a (1, tile_b) row.
    act_ref[...] = idx.reshape(1, -1)


def qnet_forward(state, packed_params, *, action_dim, tile_b=None):
    """state: [B, state_dim] f32 -> greedy action indices [B] int32."""
    w1, b1, w2, b2, w3, b3 = packed_params
    B, S = state.shape
    H_pad = w1.shape[1]
    A_pad = w3.shape[1]

    if tile_b is None:
        tile_b, num_tiles = _batch_tiling(B)
    else:
        num_tiles = pl.cdiv(B, tile_b)
    B_pad = tile_b * num_tiles

    # Only pad batch rows when needed; state stays f32 and feature-unpadded.
    x = state if B_pad == B else jnp.pad(state, ((0, B_pad - B), (0, 0)))

    kernel = functools.partial(qnet_kernel, action_dim=action_dim)

    def resident(shape):
        # Constant index_map: fetched once, stays resident in VMEM across steps.
        return pl.BlockSpec(shape, lambda i: (0, 0))

    act = pl.pallas_call(
        kernel,
        out_shape=jax.ShapeDtypeStruct((1, B_pad), jnp.int32),
        grid=(num_tiles,),
        in_specs=[
            pl.BlockSpec((tile_b, S), lambda i: (i, 0)),       # state tile per step
            resident((S, H_pad)), resident((1, H_pad)),        # layer 1
            resident((H_pad, H_pad)), resident((1, H_pad)),    # layer 2
            resident((H_pad, A_pad)), resident((1, A_pad)),    # layer 3
        ],
        out_specs=pl.BlockSpec((1, tile_b), lambda i: (0, i)),
        compiler_params=pltpu.CompilerParams(
            dimension_semantics=("parallel",)),                # batch splits across TCs
    )(x, w1, b1, w2, b2, w3, b3)

    return act.reshape(-1)[:B]


def init_params(key, state_dim, hidden_dim, action_dim):
    """Deterministic synthetic f32 weights (nn.Linear-style init) for the MLP."""
    ks = jax.random.split(key, 6)

    def lin(kw, kb, fan_in, fan_out):
        bound = 1.0 / jnp.sqrt(fan_in)
        w = jax.random.uniform(kw, (fan_in, fan_out), jnp.float32, -bound, bound)
        b = jax.random.uniform(kb, (1, fan_out), jnp.float32, -bound, bound)
        return w, b

    w1, b1 = lin(ks[0], ks[1], state_dim, hidden_dim)
    w2, b2 = lin(ks[2], ks[3], hidden_dim, hidden_dim)
    w3, b3 = lin(ks[4], ks[5], hidden_dim, action_dim)
    return (w1, b1, w2, b2, w3, b3)


def pack_params(params, state_dim, hidden_dim, action_dim, lane=LANE):
    """Pad hidden/action dims to 128-lane multiples; weights bf16, biases f32.

    The state (input-feature) dim is NOT padded: the state is passed unpadded
    and w1 keeps exactly `state_dim` rows, so no garbage lanes can reach the
    matmuls.
    """
    w1, b1, w2, b2, w3, b3 = params
    H_pad = _round_up(hidden_dim, lane)
    A_pad = _round_up(action_dim, lane)

    def pad_w(w, rows, cols):
        out = jnp.zeros((rows, cols), jnp.bfloat16)
        return out.at[:w.shape[0], :w.shape[1]].set(w.astype(jnp.bfloat16))

    def pad_b(b, cols):
        out = jnp.zeros((1, cols), jnp.float32)
        return out.at[:, :b.shape[1]].set(b)

    return (pad_w(w1, state_dim, H_pad), pad_b(b1, H_pad),
            pad_w(w2, H_pad, H_pad), pad_b(b2, H_pad),
            pad_w(w3, H_pad, A_pad), pad_b(b3, A_pad))


def ref_forward(state, params):
    """Plain-JAX reference with the same numerics (bf16 matmul inputs, f32 acc)."""
    w1, b1, w2, b2, w3, b3 = params
    xb = state.astype(jnp.bfloat16)
    h1 = jnp.maximum(jnp.dot(xb, w1.astype(jnp.bfloat16),
                             preferred_element_type=jnp.float32) + b1, 0.0)
    h2 = jnp.maximum(jnp.dot(h1.astype(jnp.bfloat16), w2.astype(jnp.bfloat16),
                             preferred_element_type=jnp.float32) + b2, 0.0)
    q = jnp.dot(h2.astype(jnp.bfloat16), w3.astype(jnp.bfloat16),
                preferred_element_type=jnp.float32) + b3
    return jnp.argmax(q, axis=1).astype(jnp.int32)


if __name__ == "__main__":
    state_dim, hidden_dim, action_dim = 16, 32, 8

    key = jax.random.PRNGKey(0)
    k_s1, k_s2, k_params = jax.random.split(key, 3)
    params = init_params(k_params, state_dim, hidden_dim, action_dim)
    packed = pack_params(params, state_dim, hidden_dim, action_dim)

    # 1) Small batch: single grid step, block == full array dims, no padding.
    state = jax.random.normal(k_s1, (8, state_dim), jnp.float32)
    actions = qnet_forward(state, packed, action_dim=action_dim)
    jax.block_until_ready(actions)
    ref = ref_forward(state, params)
    assert actions.shape == (8,)
    assert actions.dtype == jnp.int32
    assert bool(jnp.all(actions == ref))

    # 2) Multi-tile grid path (exercises tiled BlockSpecs + ragged batch pad).
    state2 = jax.random.normal(k_s2, (200, state_dim), jnp.float32)
    actions2 = qnet_forward(state2, packed, action_dim=action_dim, tile_b=128)
    jax.block_until_ready(actions2)
    ref2 = ref_forward(state2, params)
    assert actions2.shape == (200,)
    assert bool(jnp.all(actions2 == ref2))

    # NOTE: get_action()'s epsilon-greedy exploration branch is host-side RNG
    # control flow and is intentionally not part of this forward kernel.
    print("KERNEL_OK")
</pallas_src>

<mosaic_0001>
module attributes {stable_mosaic.version = 11 : i64} {
  func.func @qnet_kernel(%arg0: i32, %arg1: memref<8x16xf32, #tpu.memory_space<vmem>>, %arg2: memref<16x128xbf16, #tpu.memory_space<vmem>>, %arg3: memref<1x128xf32, #tpu.memory_space<vmem>>, %arg4: memref<128x128xbf16, #tpu.memory_space<vmem>>, %arg5: memref<1x128xf32, #tpu.memory_space<vmem>>, %arg6: memref<128x128xbf16, #tpu.memory_space<vmem>>, %arg7: memref<1x128xf32, #tpu.memory_space<vmem>>, %arg8: memref<1x8xi32, #tpu.memory_space<vmem>>) attributes {dimension_semantics = [#tpu.dimension_semantics<parallel>], iteration_bounds = array<i64: 1>, scalar_prefetch = 0 : i64, scratch_operands = 0 : i64, tpu.core_type = #tpu.core_type<tc>, window_params = [{transform_indices = @transform_0, window_bounds = array<i64: 8, 16>}, {pipeline_mode = #tpu.pipeline_mode<synchronous>, transform_indices = @transform_1, window_bounds = array<i64: 16, 128>}, {pipeline_mode = #tpu.pipeline_mode<synchronous>, transform_indices = @transform_2, window_bounds = array<i64: 1, 128>}, {pipeline_mode = #tpu.pipeline_mode<synchronous>, transform_indices = @transform_3, window_bounds = array<i64: 128, 128>}, {pipeline_mode = #tpu.pipeline_mode<synchronous>, transform_indices = @transform_4, window_bounds = array<i64: 1, 128>}, {pipeline_mode = #tpu.pipeline_mode<synchronous>, transform_indices = @transform_5, window_bounds = array<i64: 128, 128>}, {pipeline_mode = #tpu.pipeline_mode<synchronous>, transform_indices = @transform_6, window_bounds = array<i64: 1, 128>}, {transform_indices = @transform_7, window_bounds = array<i64: 1, 8>}]} {
    %c0 = arith.constant 0 : index
    %c0_0 = arith.constant 0 : index
    %0 = vector.load %arg1[%c0, %c0_0] : memref<8x16xf32, #tpu.memory_space<vmem>>, vector<8x16xf32>
    %1 = arith.truncf %0 : vector<8x16xf32> to vector<8x16xbf16>
    %c0_1 = arith.constant 0 : index
    %c0_2 = arith.constant 0 : index
    %2 = vector.load %arg2[%c0_1, %c0_2] : memref<16x128xbf16, #tpu.memory_space<vmem>>, vector<16x128xbf16>
    %cst = arith.constant dense<0.000000e+00> : vector<8x128xf32>
    %3 = tpu.matmul %1, %2, %cst {dimension_numbers = #tpu.dot_dimension_numbers<[1], [0], [0], [1], [0, 0, 1, 1], [], []>} : vector<8x16xbf16>, vector<16x128xbf16>, vector<8x128xf32> -> vector<8x128xf32>
    %c0_3 = arith.constant 0 : index
    %c0_4 = arith.constant 0 : index
    %4 = vector.load %arg3[%c0_3, %c0_4] : memref<1x128xf32, #tpu.memory_space<vmem>>, vector<1x128xf32>
    %5 = vector.broadcast %4 : vector<1x128xf32> to vector<8x128xf32>
    %6 = arith.addf %3, %5 : vector<8x128xf32>
    %cst_5 = arith.constant 0.000000e+00 : f32
    %7 = vector.broadcast %cst_5 : f32 to vector<8x128xf32>
    %8 = arith.maximumf %6, %7 : vector<8x128xf32>
    %9 = arith.truncf %8 : vector<8x128xf32> to vector<8x128xbf16>
    %c0_6 = arith.constant 0 : index
    %c0_7 = arith.constant 0 : index
    %10 = vector.load %arg4[%c0_6, %c0_7] : memref<128x128xbf16, #tpu.memory_space<vmem>>, vector<128x128xbf16>
    %cst_8 = arith.constant dense<0.000000e+00> : vector<8x128xf32>
    %11 = tpu.matmul %9, %10, %cst_8 {dimension_numbers = #tpu.dot_dimension_numbers<[1], [0], [0], [1], [0, 0, 1, 1], [], []>} : vector<8x128xbf16>, vector<128x128xbf16>, vector<8x128xf32> -> vector<8x128xf32>
    %c0_9 = arith.constant 0 : index
    %c0_10 = arith.constant 0 : index
    %12 = vector.load %arg5[%c0_9, %c0_10] : memref<1x128xf32, #tpu.memory_space<vmem>>, vector<1x128xf32>
    %13 = vector.broadcast %12 : vector<1x128xf32> to vector<8x128xf32>
    %14 = arith.addf %11, %13 : vector<8x128xf32>
    %cst_11 = arith.constant 0.000000e+00 : f32
    %15 = vector.broadcast %cst_11 : f32 to vector<8x128xf32>
    %16 = arith.maximumf %14, %15 : vector<8x128xf32>
    %17 = arith.truncf %16 : vector<8x128xf32> to vector<8x128xbf16>
    %c0_12 = arith.constant 0 : index
    %c0_13 = arith.constant 0 : index
    %18 = vector.load %arg6[%c0_12, %c0_13] : memref<128x128xbf16, #tpu.memory_space<vmem>>, vector<128x128xbf16>
    %cst_14 = arith.constant dense<0.000000e+00> : vector<8x128xf32>
    %19 = tpu.matmul %17, %18, %cst_14 {dimension_numbers = #tpu.dot_dimension_numbers<[1], [0], [0], [1], [0, 0, 1, 1], [], []>} : vector<8x128xbf16>, vector<128x128xbf16>, vector<8x128xf32> -> vector<8x128xf32>
    %c0_15 = arith.constant 0 : index
    %c0_16 = arith.constant 0 : index
    %20 = vector.load %arg7[%c0_15, %c0_16] : memref<1x128xf32, #tpu.memory_space<vmem>>, vector<1x128xf32>
    %21 = vector.broadcast %20 : vector<1x128xf32> to vector<8x128xf32>
    %22 = arith.addf %19, %21 : vector<8x128xf32>
    %23 = tpu.iota {dimensions = array<i32: 1>} : vector<8x128xi32>
    %c8_i32 = arith.constant 8 : i32
    %24 = vector.broadcast %c8_i32 : i32 to vector<8x128xi32>
    %25 = arith.cmpi slt, %23, %24 : vector<8x128xi32>
    %cst_17 = arith.constant 0xFF800000 : f32
    %26 = vector.broadcast %cst_17 : f32 to vector<8x128xf32>
    %27 = arith.select %25, %22, %26 : vector<8x128xi1>, vector<8x128xf32>
    %cst_18 = arith.constant dense<0xFF800000> : vector<8xf32>
    %28 = vector.multi_reduction <maximumf>, %27, %cst_18 [1] : vector<8x128xf32> to vector<8xf32>
    %29 = vector.shape_cast %28 : vector<8xf32> to vector<8x1xf32>
    %30 = vector.broadcast %29 : vector<8x1xf32> to vector<8x128xf32>
    %31 = arith.cmpf oeq, %27, %30 : vector<8x128xf32>
    %c128_i32 = arith.constant 128 : i32
    %32 = vector.broadcast %c128_i32 : i32 to vector<8x128xi32>
    %33 = arith.select %31, %23, %32 : vector<8x128xi1>, vector<8x128xi32>
    %cst_19 = arith.constant dense<2147483647> : vector<8xi32>
    %34 = vector.multi_reduction <minsi>, %33, %cst_19 [1] : vector<8x128xi32> to vector<8xi32>
    %35 = vector.shape_cast %34 : vector<8xi32> to vector<1x8xi32>
    %c0_20 = arith.constant 0 : index
    %c0_21 = arith.constant 0 : index
    %36 = vector.load %arg8[%c0_20, %c0_21] : memref<1x8xi32, #tpu.memory_space<vmem>>, vector<1x8xi32>
    tpu.vector_store %arg8[%c0_20, %c0_21], %35 {strides = array<i32>} : memref<1x8xi32, #tpu.memory_space<vmem>>, vector<1x8xi32>,
    return
  }
  func.func @transform_0(%arg0: i32) -> (i32, i32) {
    %c0_i32 = arith.constant 0 : i32
    %c0_i32_0 = arith.constant 0 : i32
    return %arg0, %c0_i32 : i32, i32
  }
  func.func @transform_1(%arg0: i32) -> (i32, i32) {
    %c0_i32 = arith.constant 0 : i32
    %c0_i32_0 = arith.constant 0 : i32
    %c0_i32_1 = arith.constant 0 : i32
    return %c0_i32, %c0_i32_0 : i32, i32
  }
  func.func @transform_2(%arg0: i32) -> (i32, i32) {
    %c0_i32 = arith.constant 0 : i32
    %c0_i32_0 = arith.constant 0 : i32
    %c0_i32_1 = arith.constant 0 : i32
    return %c0_i32, %c0_i32_0 : i32, i32
  }
  func.func @transform_3(%arg0: i32) -> (i32, i32) {
    %c0_i32 = arith.constant 0 : i32
    %c0_i32_0 = arith.constant 0 : i32
    %c0_i32_1 = arith.constant 0 : i32
    return %c0_i32, %c0_i32_0 : i32, i32
  }
  func.func @transform_4(%arg0: i32) -> (i32, i32) {
    %c0_i32 = arith.constant 0 : i32
    %c0_i32_0 = arith.constant 0 : i32
    %c0_i32_1 = arith.constant 0 : i32
    return %c0_i32, %c0_i32_0 : i32, i32
  }
  func.func @transform_5(%arg0: i32) -> (i32, i32) {
    %c0_i32 = arith.constant 0 : i32
    %c0_i32_0 = arith.constant 0 : i32
    %c0_i32_1 = arith.constant 0 : i32
    return %c0_i32, %c0_i32_0 : i32, i32
  }
  func.func @transform_6(%arg0: i32) -> (i32, i32) {
    %c0_i32 = arith.constant 0 : i32
    %c0_i32_0 = arith.constant 0 : i32
    %c0_i32_1 = arith.constant 0 : i32
    return %c0_i32, %c0_i32_0 : i32, i32
  }
  func.func @transform_7(%arg0: i32) -> (i32, i32) {
    %c0_i32 = arith.constant 0 : i32
    %c0_i32_0 = arith.constant 0 : i32
    return %c0_i32, %arg0 : i32, i32
  }
}

</mosaic_0001>

<bundles_post_ra>
// kernel: tpu_custom_call.1
= control target key start
LH: loop header
LB: loop body
LE: loop exit
PB: predicated region body
PF: predicated region fallthrough
CT: control target
= control target key end

     0   :  { %12 = vsyncpa [#allocation3], 0  ;;  %s791_s0 = inlined_call_operand.hbm [shape: f32[8,16], index: 0, kind: input, shape index: {}]   ;;  %s792_s1 = inlined_call_operand.hbm [shape: bf16[16,128], index: 1, kind: input, shape index: {}]   ;;  %s793_s2 = inlined_call_operand.vmem [shape: f32[1,128], index: 2, kind: input, shape index: {}]   ;;  %s794_s3 = inlined_call_operand.hbm [shape: bf16[128,128], index: 3, kind: input, shape index: {}]   ;;  %s795_s4 = inlined_call_operand.vmem [shape: f32[1,128], index: 4, kind: input, shape index: {}]   ;;  %s796_s5 = inlined_call_operand.hbm [shape: bf16[128,128], index: 5, kind: input, shape index: {}]   ;;  %s797_s6 = inlined_call_operand.vmem [shape: f32[1,128], index: 6, kind: input, shape index: {}]   ;;  %s798_s7 = inlined_call_operand.hbm [shape: s32[1,8], index: 7, kind: output, shape index: {}]  }
   0x1   :  { %13 = vsyncpa [#allocation6], 0 }
   0x2   :  { %14 = vsyncpa [#allocation9], 0 }
   0x3   :  { %15 = vsyncpa [#allocation4], 0  ;;  %s644_s24 = smov [#allocation5]   ;;  %s526_s28 = scalar_lea.hbm %s792_s1, 128 }
   0x4   :  { %s31_s25 = sshll.u32 %s644_s24, 4  ;;  %p527_p0 = scmp.ne.s32.totalorder %s792_s1, %s526_s28  ;;  %s32_s25 = int_to_ptr.vmem [resolvable:$true] %s31_s25 }
   0x5   :  { %p530_p1 = scmp.lt.u32.totalorder %s526_s28, %s792_s1 }
   0x7   :  { %p532_p2 = pnand %p530_p1, %p527_p0 }
   0x9   :  { %535 = shalt.err (!%p532_p2)
}
   0xa   :  { %s536_s10 = scalar_lea.vmem %s32_s25, 128  ;;  %p541_p4 = scmp.lt.s32.totalorder %s32_s25, %s32_s25 }
   0xb   :  { %p537_p3 = scmp.ne.s32.totalorder %s32_s25, %s536_s10  ;;  %p542_p5 = scmp.lt.s32.totalorder %s536_s10, %s536_s10 }
   0xd   :  { %p543_p6 = por %p542_p5, %p541_p4 }
   0xf   :  { %p544_p7 = pnand %p543_p6, %p537_p3 }
  0x11   :  { %547 = shalt.err (!%p544_p7)
}
  0x12   :  { %s645_s11 = smov 64   ;;  %s646_s12 = smov 4  }
  0x13   :  { %37 = dma.hbm_to_vmem [thread:$0]  %s792_s1, 128, %s32_s25, [#allocation6], %s645_s11, %s645_s11, %s646_s12  }
  0x14   :  { %s647_s15 = smov [#allocation2]   ;;  %s648_s17 = smov [#allocation7]  }
  0x15   :  { %s22_s16 = sshll.u32 %s647_s15, 4  ;;  %s45_s18 = sshll.u32 %s648_s17, 4  ;;  %s23_s16 = int_to_ptr.vmem [resolvable:$true] %s22_s16  ;;  %s46_s18 = int_to_ptr.vmem [resolvable:$true] %s45_s18 }
  0x16   :  { %s548_s21 = scalar_lea.hbm %s791_s0, 128 }
  0x17   :  { %p549_p8 = scmp.ne.s32.totalorder %s791_s0, %s548_s21  ;;  %p552_p9 = scmp.lt.u32.totalorder %s548_s21, %s791_s0 }
  0x19   :  { %p554_p10 = pnand %p552_p9, %p549_p8 }
  0x1b   :  { %557 = shalt.err (!%p554_p10)
}
  0x1c   :  { %s558_s1 = scalar_lea.vmem %s23_s16, 128  ;;  %p563_p12 = scmp.lt.s32.totalorder %s23_s16, %s23_s16 }
  0x1d   :  { %p559_p11 = scmp.ne.s32.totalorder %s23_s16, %s558_s1  ;;  %p564_p13 = scmp.lt.s32.totalorder %s558_s1, %s558_s1 }
  0x1f   :  { %p565_p0 = por %p564_p13, %p563_p12 }
  0x21   :  { %p566_p1 = pnand %p565_p0, %p559_p11 }
  0x23   :  { %569 = shalt.err (!%p566_p1)
}
  0x24   :  { %25 = dma.hbm_to_vmem [thread:$0]  %s791_s0, 128, %s23_s16, [#allocation3]  }
  0x25   :  { %s570_s30 = scalar_lea.hbm %s794_s3, 1024 }
  0x26   :  { %p571_p2 = scmp.ne.s32.totalorder %s794_s3, %s570_s30  ;;  %p574_p3 = scmp.lt.u32.totalorder %s570_s30, %s794_s3 }
  0x28   :  { %p576_p4 = pnand %p574_p3, %p571_p2 }
  0x2a   :  { %579 = shalt.err (!%p576_p4)
}
  0x2b   :  { %s580_s14 = scalar_lea.vmem %s46_s18, 1024  ;;  %p585_p6 = scmp.lt.s32.totalorder %s46_s18, %s46_s18 }
  0x2c   :  { %p581_p5 = scmp.ne.s32.totalorder %s46_s18, %s580_s14  ;;  %p586_p7 = scmp.lt.s32.totalorder %s580_s14, %s580_s14 }
  0x2e   :  { %p587_p8 = por %p586_p7, %p585_p6 }
  0x30   :  { %p588_p9 = pnand %p587_p8, %p581_p5 }
  0x32   :  { %591 = shalt.err (!%p588_p9)
}
  0x33   :  { %51 = dma.hbm_to_vmem [thread:$0]  %s794_s3, 1024, %s46_s18, [#allocation6], %s645_s11, %s645_s11, %s646_s12  }
  0x34   :  { %s649_s16 = smov [#allocation8]   ;;  %s592_s21 = scalar_lea.hbm %s796_s5, 1024 }
  0x35   :  { %s59_s17 = sshll.u32 %s649_s16, 4  ;;  %p593_p10 = scmp.ne.s32.totalorder %s796_s5, %s592_s21  ;;  %s60_s17 = int_to_ptr.vmem [resolvable:$true] %s59_s17 }
  0x36   :  { %p596_p11 = scmp.lt.u32.totalorder %s592_s21, %s796_s5 }
  0x38   :  { %p598_p12 = pnand %p596_p11, %p593_p10 }
  0x3a   :  { %601 = shalt.err (!%p598_p12)
}
  0x3b   :  { %s602_s1 = scalar_lea.vmem %s60_s17, 1024  ;;  %p607_p0 = scmp.lt.s32.totalorder %s60_s17, %s60_s17 }
  0x3c   :  { %p603_p13 = scmp.ne.s32.totalorder %s60_s17, %s602_s1  ;;  %p608_p1 = scmp.lt.s32.totalorder %s602_s1, %s602_s1 }
  0x3e   :  { %p609_p2 = por %p608_p1, %p607_p0 }
  0x40   :  { %p610_p3 = pnand %p609_p2, %p603_p13 }
  0x42   :  { %613 = shalt.err (!%p610_p3)
}
  0x43   :  { %65 = dma.hbm_to_vmem [thread:$0]  %s796_s5, 1024, %s60_s17, [#allocation9], %s645_s11, %s645_s11, %s646_s12  }
  0x44   :  { %636 = dma.done.wait [#allocation3], 128  }
  0x45   :  { %637 = vsyncadd [#allocation3], 4294967168 }
  0x46   :  { %638 = dma.done.wait [#allocation6], 1152  }
  0x47   :  { %639 = vsyncadd [#allocation6], 4294966144 }
  0x48   :  { %640 = dma.done.wait [#allocation9], 1024  }
  0x49   :  { %641 = vsyncadd [#allocation9], 4294966272  ;;  %v650_v0 = vmov 0.0   ;;  %vm651_vm0 = vmmov 0   ;;  %v509_v1 = vld [vmem:[#allocation5] sm:$0xff]   ;;  %v81_v2 = vld [vmem:[#allocation2] sm:$0xff]  ;;  %v368_v36 = vlaneseq }
  0x4a   :  { %454 = vmatprep.subr.bf16.mxu0 %v650_v0  ;;  %456 = vmatprep.mubr.msk.bf16.mxu0 %vm651_vm0, %v650_v0  ;;  %v82_v3 = vpack.c.bf16 %v81_v2, %v81_v2  ;;  %vm98_vm1 = vcmask 130048   ;;  %v510_v4 = vld [vmem:[#allocation7] sm:$0xff]   ;;  %v511_v5 = vld [vmem:[#allocation7 + $0x8] sm:$0xff]   ;;  %v512_v6 = vld [vmem:[#allocation7 + $0x10] sm:$0xff]   ;;  %vm394_vm5 = vcmask 57344  }
  0x4b   :  { %460 = vmatprep.subr.bf16.mxu1 %v650_v0  ;;  %476 = vmatprep.mubr.msk.bf16.mxu1 %vm651_vm0, %v650_v0  ;;  %v513_v7 = vld [vmem:[#allocation7 + $0x18] sm:$0xff]   ;;  %v514_v8 = vld [vmem:[#allocation7 + $0x20] sm:$0xff]   ;;  %v515_v9 = vld [vmem:[#allocation7 + $0x28] sm:$0xff]   ;;  %v369_v37 = vand.u32 127, %v368_v36  ;;  %v391_v54 = vshrl.u32 %v368_v36, 7 }
  0x4c   :  { %455 = vmatpush3.bf16.msra.mxu0 %v509_v1  ;;  %461 = vmatpush3.bf16.msra.mxu1 %v510_v4  ;;  %v516_v10 = vld [vmem:[#allocation7 + $0x30] sm:$0xff]   ;;  %v517_v11 = vld [vmem:[#allocation7 + $0x38] sm:$0xff]   ;;  %v518_v12 = vld [vmem:[#allocation8] sm:$0xff]  }
  0x4d   :  { %480 = vmatprep.subr.bf16.mxu0 %v650_v0  ;;  %462 = vmatprep.subr.bf16.mxu1 %v650_v0  ;;  %v519_v13 = vld [vmem:[#allocation8 + $0x8] sm:$0xff]   ;;  %v520_v14 = vld [vmem:[#allocation8 + $0x10] sm:$0xff]   ;;  %v521_v15 = vld [vmem:[#allocation8 + $0x18] sm:$0xff]   ;;  %vm370_vm2 = vcmp.lt.s32.totalorder %v369_v37, 8  ;;  %v392_v57 = vsub.s32 %v369_v37, %v391_v54 }
  0x4e   :  { %v522_v16 = vld [vmem:[#allocation8 + $0x20] sm:$0xff]   ;;  %v523_v17 = vld [vmem:[#allocation8 + $0x28] sm:$0xff]   ;;  %v413_v18 = vld [vmem:[%s793_s2] ss:$0 sm:$0xff] }
  0x4f   :  { %457 = vmatmul.mubr.msk.bf16.vlgmr.msra.gmra.mrb[0].mxu0 %vm98_vm1, %v82_v3  ;;  %v524_v26 = vld [vmem:[#allocation8 + $0x30] sm:$0xff]   ;;  %v525_v27 = vld [vmem:[#allocation8 + $0x38] sm:$0xff]  }
  0x50   :  { %496 = vmatprep.mubr.msk.bf16.mxu0 %vm651_vm0, %v650_v0  ;;  %463 = vmatpush3.bf16.msra.mxu1 %v511_v5  ;;  %v416_v28 = vld [vmem:[%s795_s4] ss:$0 sm:$0xff]  ;;  %s652_s4 = smov [#allocation10]  }
  0x51   :  { %464 = vmatprep.subr.bf16.mxu1 %v650_v0  ;;  %481 = vmatpush3.bf16.msra.mxu0 %v518_v12  ;;  %v425_v38 = vld [vmem:[%s797_s6] ss:$0 sm:$0xff]  ;;  %s402_s6 = sshll.u32 %s652_s4, 4  ;;  %s403_s6 = int_to_ptr.vmem [resolvable:$true] %s402_s6 }
  0x52   :  { %482 = vmatprep.subr.bf16.mxu0 %v650_v0  ;;  %s614_s28 = scalar_lea.vmem %s403_s6, 16  ;;  %s618_s29 = scalar_lea.vmem %s403_s6, 32 }
  0x53   :  { %p615_p4 = scmp.ne.s32.totalorder %s403_s6, %s614_s28  ;;  %p619_p5 = scmp.lt.s32.totalorder %s403_s6, %s403_s6 }
  0x54   :  { %465 = vmatpush3.bf16.msra.mxu1 %v512_v6  ;;  %p620_p6 = scmp.lt.s32.totalorder %s618_s29, %s614_s28 }
  0x55   :  { %466 = vmatprep.subr.bf16.mxu1 %v650_v0  ;;  %483 = vmatpush3.bf16.msra.mxu0 %v519_v13 }
  0x56   :  { %484 = vmatprep.subr.bf16.mxu0 %v650_v0  ;;  %p621_p7 = por %p620_p6, %p619_p5 }
  0x58   :  { %467 = vmatpush3.bf16.msra.mxu1 %v513_v7  ;;  %p622_p8 = pnand %p621_p7, %p615_p4 }
  0x59   :  { %468 = vmatprep.subr.bf16.mxu1 %v650_v0  ;;  %485 = vmatpush3.bf16.msra.mxu0 %v520_v14 }
  0x5a   :  { %486 = vmatprep.subr.bf16.mxu0 %v650_v0 }
  0x5c   :  { %469 = vmatpush3.bf16.msra.mxu1 %v514_v8 }
  0x5d   :  { %470 = vmatprep.subr.bf16.mxu1 %v650_v0  ;;  %487 = vmatpush3.bf16.msra.mxu0 %v521_v15 }
  0x5e   :  { %488 = vmatprep.subr.bf16.mxu0 %v650_v0 }
  0x60   :  { %471 = vmatpush3.bf16.msra.mxu1 %v515_v9 }
  0x61   :  { %472 = vmatprep.subr.bf16.mxu1 %v650_v0  ;;  %489 = vmatpush3.bf16.msra.mxu0 %v522_v16 }
  0x62   :  { %490 = vmatprep.subr.bf16.mxu0 %v650_v0 }
  0x64   :  { %473 = vmatpush3.bf16.msra.mxu1 %v516_v10 }
  0x65   :  { %474 = vmatprep.subr.bf16.mxu1 %v650_v0  ;;  %491 = vmatpush3.bf16.msra.mxu0 %v523_v17 }
  0x66   :  { %492 = vmatprep.subr.bf16.mxu0 %v650_v0 }
  0x68   :  { %475 = vmatpush3.bf16.msra.mxu1 %v517_v11 }
  0x69   :  { %493 = vmatpush3.bf16.msra.mxu0 %v524_v26 }
  0x6a   :  { %494 = vmatprep.subr.bf16.mxu0 %v650_v0 }
  0x6d   :  { %495 = vmatpush3.bf16.msra.mxu0 %v525_v27 }
 0x122   :  { %v136_v19 = vpop.f32.mrb[0].mxu0 }
 0x123   :  { %v137_v20 = vadd.f32 %v413_v18, %v136_v19  ;;  %v458_v21 = vpop.f32.mrb[1].mxu0 }
 0x124   :  { %v139_v22 = vpop.f32.mrb[2].mxu0 }
 0x125   :  { %v142_v23 = vmax.f32 %v137_v20, 0.0  ;;  %v459_v24 = vpop.f32.mrb[3].mxu0 }
 0x127   :  { %v143_v25 = vpack.c.bf16 %v142_v23, %v142_v23 }
 0x129   :  { %477 = vmatmul.mubr.bf16.vlgmr.msra.gmra.mrb[0].mxu1 %v143_v25 }
 0x1fc   :  { %v249_v29 = vpop.f32.mrb[0].mxu1 }
 0x1fd   :  { %v250_v30 = vadd.f32 %v416_v28, %v249_v29  ;;  %v478_v31 = vpop.f32.mrb[1].mxu1 }
 0x1fe   :  { %v252_v32 = vpop.f32.mrb[2].mxu1 }
 0x1ff   :  { %v255_v33 = vmax.f32 %v250_v30, 0.0  ;;  %v479_v34 = vpop.f32.mrb[3].mxu1 }
 0x201   :  { %v256_v35 = vpack.c.bf16 %v255_v33, %v255_v33 }
 0x203   :  { %497 = vmatmul.mubr.bf16.vlgmr.msra.gmra.mrb[4].mxu0 %v256_v35 }
 0x2d6   :  { %v362_v39 = vpop.f32.mrb[4].mxu0 }
 0x2d7   :  { %v363_v40 = vadd.f32 %v425_v38, %v362_v39  ;;  %v498_v41 = vpop.f32.mrb[5].mxu0 }
 0x2d8   :  { %v365_v42 = vpop.f32.mrb[6].mxu0 }
 0x2d9   :  { %v499_v43 = vpop.f32.mrb[7].mxu0  ;;  %v371_v44 = vsel %vm370_vm2, %v363_v40, -inf }
 0x2da   :  { %372 = vmax.xlane.f32.xlu0 %v371_v44 }
 0x367   :  { %v373_v45 = vpop.xlane.xlu0 %372 }
 0x368   :  { %vm374_vm3 = vcmp.eq.f32.partialorder %v371_v44, %v373_v45 }
 0x369   :  { %v375_v46 = vsel %vm374_vm3, %v369_v37, 128 }
 0x36a   :  { %v377_v47 = vshra.s32 %v375_v46, 16  ;;  %v376_v49 = vand.u32 65535, %v375_v46 }
 0x36c   :  { %v379_v48 = vcvt.s32.f32 %v377_v47  ;;  %v378_v51 = vcvt.s32.f32 %v376_v49 }
 0x36e   :  { %380 = vmin.xlane.f32.xlu0 %v379_v48 }
 0x3fb   :  { %v381_v50 = vpop.xlane.xlu0 %380 }
 0x3fc   :  { %vm382_vm4 = vcmp.eq.f32.partialorder %v379_v48, %v381_v50  ;;  %v387_v53 = vcvt.f32.s32 %v381_v50 }
 0x3fd   :  { %v383_v52 = vsel %vm382_vm4, %v378_v51, inf }
 0x3fe   :  { %384 = vmin.xlane.f32.xlu1 %v383_v52  ;;  %v388_v56 = vshll.u32 %v387_v53, 16 }
 0x48b   :  { %v385_v55 = vpop.xlane.xlu1 %384 }
 0x48c   :  { %v386_v58 = vcvt.f32.s32 %v385_v55 }
 0x48e   :  { %v389_v59 = vadd.s32 %v388_v56, %v386_v58 }
 0x490   :  { %v393_v60 = vrot.slane %v389_v59, %v392_v57 }
 0x492   :  { %395 = vst.msk [vmem:[#allocation10] sm:$0x1] %vm394_vm5, %v393_v60 }
 0x493   :  { %625 = shalt.err (!%p622_p8)
}
 0x494   :  { %s626_s9 = scalar_lea.hbm %s798_s7, 16 }
 0x495   :  { %p627_p9 = scmp.ne.s32.totalorder %s798_s7, %s626_s9  ;;  %p630_p10 = scmp.lt.u32.totalorder %s626_s9, %s798_s7 }
 0x497   :  { %p632_p11 = pnand %p630_p10, %p627_p9 }
 0x499   :  { %635 = shalt.err (!%p632_p11)
}
 0x49a   :  { %405 = dma.vmem_to_hbm [thread:$0]  %s403_s6, 16, %s798_s7, [#allocation4]  }
 0x49b   :  { %642 = dma.done.wait [#allocation4], 16  }
 0x49c   :  { %643 = vsyncadd [#allocation4], 4294967280 }
 0x49d   :  { %409 = vsyncpa [#allocation3], 1 }
 0x49e   :  { %410 = vsyncpa [#allocation6], 1 }
 0x49f   :  { %411 = vsyncpa [#allocation9], 1 }
 0x4a0   :  { %412 = vsyncpa [#allocation4], 1 }

</bundles_post_ra>
